<compile_context>
chip_gen: v7x
topology: tpu7x:2x2x1
jax: 0.10.0
libtpu: 0.0.40
codegen_flags: <defaults>
</compile_context>

<pallas_src>
import jax
import jax.numpy as jnp
from jax.experimental import pallas as pl
from jax.experimental.pallas import tpu as pltpu


def _round_up(n, m):
    return ((n + m - 1) // m) * m


def _hamiltonian_kernel(x_ref, w1_ref, b1_ref, w2_ref, o_ref):
    # Fused block-diagonal first layer: a single MXU matmul covers V and T.
    h = jnp.tanh(
        jnp.dot(x_ref[...], w1_ref[...], preferred_element_type=jnp.float32)
        + b1_ref[...]
    )
    # Second layer (2*hidden -> 1): VPU multiply + XLU lane reduction.  The
    # multiply uses the VALU slot and the reduction the XLU slot, so it
    # overlaps with the next tile's matmul instead of wasting an MXU pass.
    o_ref[...] = jnp.sum(h * w2_ref[...], axis=-1, keepdims=True).astype(o_ref.dtype)


def fuse_params(params, dim, hidden):
    """Build fused block-diagonal parameters consumed by the kernel."""
    w1 = jnp.zeros((2 * dim, 2 * hidden), jnp.float32)
    w1 = w1.at[:dim, :hidden].set(params["w1v"])
    w1 = w1.at[dim:, hidden:].set(params["w1t"])
    b1 = jnp.concatenate([params["b1v"], params["b1t"]], axis=-1)          # (1, 2H)
    w2 = jnp.concatenate([params["w2v"][:, 0], params["w2t"][:, 0]])       # (2H,)
    w2 = w2.reshape(1, 2 * hidden)                                         # (1, 2H)
    return w1, b1, w2


def separable_hamiltonian(x, w1, b1, w2, *, block_rows=1024):
    """x: (B, 2*dim) float32. w1/b1/w2: fused params from fuse_params.

    Returns (B, 1) float32 = V(q) + T(p).
    """
    B, in_dim = x.shape
    two_h = w1.shape[1]

    # Batch tile: multiple of 8 sublanes, capped at block_rows (a multiple of
    # 128 so large tiles stay lane-friendly); pad the batch tail if needed.
    tb = min(block_rows, _round_up(B, 8))
    bp = _round_up(B, tb)
    if bp != B:
        x = jnp.pad(x, ((0, bp - B), (0, 0)))
    grid = (bp // tb,)

    flops = 2 * bp * in_dim * two_h + 2 * bp * two_h
    bytes_accessed = 4 * (bp * in_dim + bp + w1.size + b1.size + w2.size)

    out = pl.pallas_call(
        _hamiltonian_kernel,
        out_shape=jax.ShapeDtypeStruct((bp, 1), jnp.float32),
        grid=grid,
        in_specs=[
            pl.BlockSpec((tb, in_dim), lambda i: (i, 0)),   # x tile, pipelined
            pl.BlockSpec(w1.shape, lambda i: (0, 0)),       # weights resident
            pl.BlockSpec(b1.shape, lambda i: (0, 0)),
            pl.BlockSpec(w2.shape, lambda i: (0, 0)),
        ],
        out_specs=pl.BlockSpec((tb, 1), lambda i: (i, 0)),
        compiler_params=pltpu.CompilerParams(
            dimension_semantics=("parallel",),
        ),
        cost_estimate=pl.CostEstimate(
            flops=flops,
            transcendentals=bp * two_h,
            bytes_accessed=bytes_accessed,
        ),
    )(x, w1, b1, w2)
    return out[:B]


# ---------------- deterministic parameter initialization ----------------

def _orthogonal(key, rows, cols):
    """Semi-orthogonal matrix of shape (rows, cols), like torch.nn.init.orthogonal_."""
    flip = rows < cols
    r, c = (cols, rows) if flip else (rows, cols)
    a = jax.random.normal(key, (r, c), dtype=jnp.float32)
    q, rmat = jnp.linalg.qr(a)
    q = q * jnp.sign(jnp.diag(rmat))[None, :]
    return q.T if flip else q


def init_params(key, dim, hidden):
    ks = jax.random.split(key, 8)
    k_bias = 1.0 / jnp.sqrt(jnp.float32(dim))
    # PyTorch Linear stores W as (out, in); we keep (in, out) for x @ W.
    w1v = _orthogonal(ks[0], hidden, dim).T            # (dim, hidden)
    w2v = _orthogonal(ks[1], 1, hidden).T              # (hidden, 1)
    w1t = _orthogonal(ks[2], hidden, dim).T            # (dim, hidden)
    w2t = _orthogonal(ks[3], 1, hidden).T              # (hidden, 1)
    b1v = jax.random.uniform(ks[4], (1, hidden), jnp.float32, -k_bias, k_bias)
    b1t = jax.random.uniform(ks[5], (1, hidden), jnp.float32, -k_bias, k_bias)
    return {"w1v": w1v, "b1v": b1v, "w2v": w2v,
            "w1t": w1t, "b1t": b1t, "w2t": w2t}


def reference(x, params, dim):
    q = x[:, :dim]
    p = x[:, dim:]
    v = jnp.tanh(q @ params["w1v"] + params["b1v"]) @ params["w2v"]
    t = jnp.tanh(p @ params["w1t"] + params["b1t"]) @ params["w2t"]
    return v + t


if __name__ == "__main__":
    key = jax.random.PRNGKey(0)
    k_x, k_p = jax.random.split(key)

    B = 8
    in_dim = 8          # module's in_dim (full state dimension, 2*dim)
    dim = in_dim // 2   # q/p dimension
    hidden = 32

    x = jax.random.normal(k_x, (B, in_dim), dtype=jnp.float32)
    params = init_params(k_p, dim, hidden)
    w1, b1, w2 = fuse_params(params, dim, hidden)

    out = separable_hamiltonian(x, w1, b1, w2)
    out = jax.block_until_ready(out)

    ref = reference(x, params, dim)
    assert out.shape == (B, 1), out.shape
    assert jnp.allclose(out, ref, atol=1e-5, rtol=1e-5), (out, ref)

    # Also exercise a batch that is not a multiple of the tile (padding path).
    B2 = 20
    x2 = jax.random.normal(jax.random.PRNGKey(7), (B2, in_dim), dtype=jnp.float32)
    out2 = jax.block_until_ready(separable_hamiltonian(x2, w1, b1, w2))
    ref2 = reference(x2, params, dim)
    assert out2.shape == (B2, 1), out2.shape
    assert jnp.allclose(out2, ref2, atol=1e-5, rtol=1e-5), (out2, ref2)

    print("KERNEL_OK")
</pallas_src>

<mosaic_0001>
module attributes {stable_mosaic.version = 11 : i64} {
  func.func @_hamiltonian_kernel(%arg0: i32, %arg1: memref<8x8xf32, #tpu.memory_space<vmem>>, %arg2: memref<8x64xf32, #tpu.memory_space<vmem>>, %arg3: memref<1x64xf32, #tpu.memory_space<vmem>>, %arg4: memref<1x64xf32, #tpu.memory_space<vmem>>, %arg5: memref<8x1xf32, #tpu.memory_space<vmem>>) attributes {dimension_semantics = [#tpu.dimension_semantics<parallel>], iteration_bounds = array<i64: 1>, scalar_prefetch = 0 : i64, scratch_operands = 0 : i64, tpu.core_type = #tpu.core_type<tc>, window_params = [{transform_indices = @transform_0, window_bounds = array<i64: 8, 8>}, {pipeline_mode = #tpu.pipeline_mode<synchronous>, transform_indices = @transform_1, window_bounds = array<i64: 8, 64>}, {pipeline_mode = #tpu.pipeline_mode<synchronous>, transform_indices = @transform_2, window_bounds = array<i64: 1, 64>}, {pipeline_mode = #tpu.pipeline_mode<synchronous>, transform_indices = @transform_3, window_bounds = array<i64: 1, 64>}, {transform_indices = @transform_4, window_bounds = array<i64: 8, 1>}]} {
    %c0 = arith.constant 0 : index
    %c0_0 = arith.constant 0 : index
    %0 = vector.load %arg1[%c0, %c0_0] : memref<8x8xf32, #tpu.memory_space<vmem>>, vector<8x8xf32>
    %c0_1 = arith.constant 0 : index
    %c0_2 = arith.constant 0 : index
    %1 = vector.load %arg2[%c0_1, %c0_2] : memref<8x64xf32, #tpu.memory_space<vmem>>, vector<8x64xf32>
    %cst = arith.constant dense<0.000000e+00> : vector<8x64xf32>
    %2 = tpu.matmul %0, %1, %cst {dimension_numbers = #tpu.dot_dimension_numbers<[1], [0], [0], [1], [0, 0, 1, 1], [], []>} : vector<8x8xf32>, vector<8x64xf32>, vector<8x64xf32> -> vector<8x64xf32>
    %c0_3 = arith.constant 0 : index
    %c0_4 = arith.constant 0 : index
    %3 = vector.load %arg3[%c0_3, %c0_4] : memref<1x64xf32, #tpu.memory_space<vmem>>, vector<1x64xf32>
    %4 = vector.broadcast %3 : vector<1x64xf32> to vector<8x64xf32>
    %5 = arith.addf %2, %4 : vector<8x64xf32>
    %6 = math.tanh %5 : vector<8x64xf32>
    %c0_5 = arith.constant 0 : index
    %c0_6 = arith.constant 0 : index
    %7 = vector.load %arg4[%c0_5, %c0_6] : memref<1x64xf32, #tpu.memory_space<vmem>>, vector<1x64xf32>
    %8 = vector.broadcast %7 : vector<1x64xf32> to vector<8x64xf32>
    %9 = arith.mulf %6, %8 : vector<8x64xf32>
    %cst_7 = arith.constant dense<0.000000e+00> : vector<8xf32>
    %10 = vector.multi_reduction <add>, %9, %cst_7 [1] : vector<8x64xf32> to vector<8xf32>
    %11 = vector.shape_cast %10 : vector<8xf32> to vector<8x1xf32>
    %c0_8 = arith.constant 0 : index
    %c0_9 = arith.constant 0 : index
    %12 = vector.load %arg5[%c0_8, %c0_9] : memref<8x1xf32, #tpu.memory_space<vmem>>, vector<8x1xf32>
    tpu.vector_store %arg5[%c0_8, %c0_9], %11 {strides = array<i32>} : memref<8x1xf32, #tpu.memory_space<vmem>>, vector<8x1xf32>,
    return
  }
  func.func @transform_0(%arg0: i32) -> (i32, i32) {
    %c0_i32 = arith.constant 0 : i32
    %c0_i32_0 = arith.constant 0 : i32
    return %arg0, %c0_i32 : i32, i32
  }
  func.func @transform_1(%arg0: i32) -> (i32, i32) {
    %c0_i32 = arith.constant 0 : i32
    %c0_i32_0 = arith.constant 0 : i32
    %c0_i32_1 = arith.constant 0 : i32
    return %c0_i32, %c0_i32_0 : i32, i32
  }
  func.func @transform_2(%arg0: i32) -> (i32, i32) {
    %c0_i32 = arith.constant 0 : i32
    %c0_i32_0 = arith.constant 0 : i32
    %c0_i32_1 = arith.constant 0 : i32
    return %c0_i32, %c0_i32_0 : i32, i32
  }
  func.func @transform_3(%arg0: i32) -> (i32, i32) {
    %c0_i32 = arith.constant 0 : i32
    %c0_i32_0 = arith.constant 0 : i32
    %c0_i32_1 = arith.constant 0 : i32
    return %c0_i32, %c0_i32_0 : i32, i32
  }
  func.func @transform_4(%arg0: i32) -> (i32, i32) {
    %c0_i32 = arith.constant 0 : i32
    %c0_i32_0 = arith.constant 0 : i32
    return %arg0, %c0_i32 : i32, i32
  }
}

</mosaic_0001>

<bundles_post_ra>
// kernel: tpu_custom_call.1
= control target key start
LH: loop header
LB: loop body
LE: loop exit
PB: predicated region body
PF: predicated region fallthrough
CT: control target
= control target key end

     0   :  { %9 = vsyncpa [#allocation3], 0  ;;  %s271_s0 = inlined_call_operand.hbm [shape: f32[8,8], index: 0, kind: input, shape index: {}]   ;;  %s272_s1 = inlined_call_operand.hbm [shape: f32[8,64], index: 1, kind: input, shape index: {}]   ;;  %s273_s2 = inlined_call_operand.vmem [shape: f32[1,64], index: 2, kind: input, shape index: {}]   ;;  %s274_s3 = inlined_call_operand.vmem [shape: f32[1,64], index: 3, kind: input, shape index: {}]   ;;  %s275_s4 = inlined_call_operand.vmem [shape: f32[8,1], index: 4, kind: output, shape index: {}]  }
   0x1   :  { %10 = vsyncpa [#allocation5], 0  ;;  %s209_s15 = smov [#allocation2]   ;;  %s210_s17 = smov [#allocation4]  }
   0x2   :  { %s17_s16 = sshll.u32 %s209_s15, 4  ;;  %s27_s18 = sshll.u32 %s210_s17, 4  ;;  %s18_s16 = int_to_ptr.vmem [resolvable:$true] %s17_s16  ;;  %s28_s18 = int_to_ptr.vmem [resolvable:$true] %s27_s18 }
   0x3   :  { %s161_s21 = scalar_lea.hbm %s271_s0, 128 }
   0x4   :  { %p162_p0 = scmp.ne.s32.totalorder %s271_s0, %s161_s21  ;;  %p165_p1 = scmp.lt.u32.totalorder %s161_s21, %s271_s0 }
   0x6   :  { %p167_p2 = pnand %p165_p1, %p162_p0 }
   0x8   :  { %170 = shalt.err (!%p167_p2)
}
   0x9   :  { %s171_s26 = scalar_lea.vmem %s18_s16, 128  ;;  %p176_p4 = scmp.lt.s32.totalorder %s18_s16, %s18_s16 }
   0xa   :  { %p172_p3 = scmp.ne.s32.totalorder %s18_s16, %s171_s26  ;;  %p177_p5 = scmp.lt.s32.totalorder %s171_s26, %s171_s26 }
   0xc   :  { %p178_p6 = por %p177_p5, %p176_p4 }
   0xe   :  { %p179_p7 = pnand %p178_p6, %p172_p3 }
  0x10   :  { %182 = shalt.err (!%p179_p7)
}
  0x11   :  { %20 = dma.hbm_to_vmem [thread:$0]  %s271_s0, 128, %s18_s16, [#allocation3]  }
  0x12   :  { %s183_s5 = scalar_lea.hbm %s272_s1, 128 }
  0x13   :  { %p184_p8 = scmp.ne.s32.totalorder %s272_s1, %s183_s5  ;;  %p187_p9 = scmp.lt.u32.totalorder %s183_s5, %s272_s1 }
  0x15   :  { %p189_p10 = pnand %p187_p9, %p184_p8 }
  0x17   :  { %192 = shalt.err (!%p189_p10)
}
  0x18   :  { %s193_s10 = scalar_lea.vmem %s28_s18, 128  ;;  %p198_p12 = scmp.lt.s32.totalorder %s28_s18, %s28_s18 }
  0x19   :  { %p194_p11 = scmp.ne.s32.totalorder %s28_s18, %s193_s10  ;;  %p199_p13 = scmp.lt.s32.totalorder %s193_s10, %s193_s10 }
  0x1b   :  { %p200_p0 = por %p199_p13, %p198_p12 }
  0x1d   :  { %p201_p1 = pnand %p200_p0, %p194_p11 }
  0x1f   :  { %204 = shalt.err (!%p201_p1)
}
  0x20   :  { %30 = dma.hbm_to_vmem [thread:$0]  %s272_s1, 128, %s28_s18, [#allocation5]  }
  0x21   :  { %205 = dma.done.wait [#allocation3], 128  }
  0x22   :  { %206 = vsyncadd [#allocation3], 4294967168 }
  0x23   :  { %207 = dma.done.wait [#allocation5], 128  }
  0x24   :  { %208 = vsyncadd [#allocation5], 4294967168  ;;  %v211_v0 = vmov 0.0   ;;  %vm212_vm0 = vmmov 0   ;;  %vm50_vm1 = vcmask 64512   ;;  %v42_v1 = vld [vmem:[#allocation4] sm:$0xff] }
  0x25   :  { %150 = vmatprep.subr.mxu0 %v211_v0  ;;  %152 = vmatprep.mubr.msk.f32.mxu0 %vm212_vm0, %v211_v0  ;;  %v41_v2 = vld [vmem:[#allocation2] sm:$0xff]  ;;  %v145_v3 = vld [vmem:[%s273_s2] ss:$0 sm:$0xff]  ;;  %vm133_vm2 = vcmask 523264   ;;  %vm137_vm3 = vcmask 7168  }
  0x26   :  { %151 = vmatpush3.msra.mxu0 %v42_v1  ;;  %v147_v7 = vld [vmem:[%s274_s3] ss:$0 sm:$0xff] }
  0x27   :  { %153 = vmatmul.mubr.msk.f32.vlgmr.msra.gmra.mrb[0].mxu0 %vm50_vm1, %v41_v2 }
  0xfa   :  { %v120_v4 = vpop.f32.mrb[0].mxu0 }
  0xfb   :  { %v121_v5 = vadd.f32 %v145_v3, %v120_v4  ;;  %v154_v6 = vpop.f32.mrb[1].mxu0 }
  0xfd   :  { %159 = vtanh.f32 %v121_v5 }
 0x107   :  { %v160_v8 = vpop.eup %159 }
 0x108   :  { %v132_v9 = vmul.f32 %v160_v8, %v147_v7 }
 0x10a   :  { %v134_v10 = vsel %vm133_vm2, %v132_v9, 0.0 }
 0x10b   :  { %135 = vadd.xlane.f32.xlu0 %v134_v10 }
 0x198   :  { %v136_v11 = vpop.xlane.xlu0 %135 }
 0x199   :  { %138 = vst.msk [vmem:[%s275_s4] sm:$0xff] %vm137_vm3, %v136_v11 }
 0x19a   :  { %143 = vsyncpa [#allocation3], 1 }
 0x19b   :  { %144 = vsyncpa [#allocation5], 1 }

</bundles_post_ra>
